<compile_context>
chip_gen: v5e
topology: v5e:2x2
jax: 0.10.0
libtpu: 0.0.40
codegen_flags: <defaults>
</compile_context>

<pallas_src>
import functools

import jax
import jax.numpy as jnp
import numpy as np
from jax.experimental import pallas as pl
from jax.experimental.pallas import tpu as pltpu

_LANE = 128


def _embedding_kernel(x_ref, wbig_ref, fb2_ref, wrff_ref, wpoly_ref, o_ref, *,
                      d_out, d_pad, r_pad, n_rff, n_poly,
                      num_poly_feats, degree_values):
    f32 = jnp.float32
    x = x_ref[...]                                   # native dtype LHS

    # One wide MXU pass for everything that contracts against x:
    #   [ x @ Wp[:L] | x @ fw2 | x @ one-hot-select ]   (each block 128-aligned)
    big = jnp.dot(x, wbig_ref[...], preferred_element_type=f32)

    # 1) plain-x projection slice.
    acc = big[:, :d_out]

    # 2) fused RFF: sin over duplicated frequencies == [sin(wx) | cos(wx)].
    wx2 = big[:, d_pad:d_pad + n_rff] + fb2_ref[...]
    rff = jnp.sin(wx2)
    acc = acc + jnp.dot(rff, wrff_ref[...], preferred_element_type=f32)

    # 3) polynomial features: factor levels live side by side in the select
    #    block; multiply them, masking levels missing for lower degrees.
    sel_off = d_pad + r_pad

    def lvl(j):
        return big[:, sel_off + j * n_poly: sel_off + (j + 1) * n_poly]

    prod = lvl(0) * lvl(1)                           # every degree is >= 2
    for j in range(2, max(degree_values)):           # static unroll
        thresh = num_poly_feats * sum(1 for v in degree_values if v <= j)
        lane = jax.lax.broadcasted_iota(jnp.int32, prod.shape, 1)
        prod = jnp.where(lane >= thresh, prod * lvl(j), prod)
    acc = acc + jnp.dot(prod, wpoly_ref[...], preferred_element_type=f32)

    o_ref[...] = acc.astype(o_ref.dtype)


def _round_up(n, m):
    return ((n + m - 1) // m) * m


def _pick_row_tile(rows, sublane, max_tile):
    """Largest sublane-aligned tile <= max_tile, preferring exact divisors of
    rows and >=2 grid steps (so v7x can shard the parallel axis on 2 TCs)."""
    cap = min(max_tile, rows)
    cap = (cap // sublane) * sublane
    if cap < sublane:
        return rows                       # tiny input: one full-extent block
    if rows >= 2 * sublane:               # leave >=2 grid steps when possible
        half = ((rows // 2) // sublane) * sublane
        cap = min(cap, max(half, sublane))
    floor = max(sublane, cap // 2)
    t = cap
    while t >= floor:
        if rows % t == 0:
            return t                      # exact tiling -> no ragged block
        t -= sublane
    return cap                            # ragged last step (Pallas masks it)


def patchtst_kernel_embedding(x, patch_indices, freq_weights, freq_biases,
                              proj_weight, *, row_tile_target=2048,
                              out_dtype=None):
    """Pallas forward pass of PatchTSTKernelEmbedding.

    x:             (..., patch_length)
    patch_indices: list of int arrays (one per poly degree), shape (F, degree)
    freq_weights:  (patch_length, num_rff // 2)
    freq_biases:   broadcastable bias over the last dim (num_rff // 2)
    proj_weight:   (d_model, d_model) torch nn.Linear weight (y = f @ W.T)
    """
    L = x.shape[-1]
    R2 = freq_weights.shape[-1]
    n_rff = 2 * R2
    D = proj_weight.shape[0]
    F = int(np.asarray(patch_indices[0]).shape[0])
    degree_values = tuple(int(np.asarray(p).shape[1]) for p in patch_indices)
    n_poly = F * len(degree_values)
    max_deg = max(degree_values)
    assert D == L + n_poly + n_rff, (
        "d_model must equal patch_length + num_poly + num_rff")
    assert min(degree_values) >= 2 and list(degree_values) == sorted(degree_values), (
        "polynomial degrees must be ascending and >= 2 (as in the module)")

    # ---- host-side static parameter prep -----------------------------------
    # One-hot "gather" matrix, factor levels side by side:
    #   column (j * n_poly + d * F + p) selects x[:, idx_d[p, j]].
    sel_np = np.zeros((L, max_deg * n_poly), np.float32)
    for d, idx in enumerate(patch_indices):
        idx_np = np.asarray(idx)
        for j in range(idx_np.shape[1]):
            sel_np[idx_np[:, j], j * n_poly + d * F + np.arange(F)] = 1.0

    # Fused sin/cos frequencies & biases: sin(theta + pi/2) == cos(theta).
    fw = jnp.asarray(freq_weights, jnp.float32)
    fb = jnp.asarray(freq_biases, jnp.float32).reshape(1, R2)
    fw2 = jnp.concatenate([fw, fw], axis=1)                       # (L, 2*R2)
    fb2 = jnp.concatenate([fb, fb + np.float32(np.pi / 2)], axis=1)

    # Projection weight split by feature block (torch Linear: y = f @ W.T).
    wp = jnp.asarray(proj_weight, jnp.float32).T                  # (D_in, D_out)
    wpx, wpp, wrff = wp[:L], wp[L:L + n_poly], wp[L + n_poly:]

    # Merged x-LHS RHS; every block zero-padded to a 128-lane boundary.
    d_pad = _round_up(D, _LANE)
    r_pad = _round_up(n_rff, _LANE)
    s_pad = _round_up(max_deg * n_poly, _LANE)

    def pad_cols(a, w):
        return jnp.pad(a, ((0, 0), (0, w - a.shape[1])))

    wbig = jnp.concatenate([pad_cols(wpx, d_pad), pad_cols(fw2, r_pad),
                            pad_cols(jnp.asarray(sel_np), s_pad)], axis=1)
    big_w = d_pad + r_pad + s_pad

    x2d = x.reshape(-1, L)
    rows = x2d.shape[0]
    if out_dtype is None:
        out_dtype = jnp.result_type(x.dtype, jnp.asarray(proj_weight).dtype)

    # ---- dtype/sublane-aware, lane-padding-aware VMEM-budgeted row tile -----
    itemsize = jnp.dtype(x.dtype).itemsize
    out_itemsize = jnp.dtype(out_dtype).itemsize
    sublane = {4: 8, 2: 16, 1: 32}.get(itemsize, 8)
    bytes_per_row = (
        2 * _round_up(L, _LANE) * itemsize            # x block (double-buffered)
        + 2 * _round_up(D, _LANE) * out_itemsize      # out block (double-buffered)
        + 4 * big_w                                   # wide matmul result
        + 4 * (_round_up(n_rff, _LANE) + _round_up(n_poly, _LANE)
               + 2 * _round_up(D, _LANE))             # rff / prod / acc temps
    )
    budget_rows = max(sublane, (20 * 1024 * 1024) // bytes_per_row)
    row_tile = _pick_row_tile(rows, sublane, min(row_tile_target, budget_rows))
    grid = (pl.cdiv(rows, row_tile),)

    out2d = pl.pallas_call(
        functools.partial(_embedding_kernel, d_out=D, d_pad=d_pad, r_pad=r_pad,
                          n_rff=n_rff, n_poly=n_poly, num_poly_feats=F,
                          degree_values=degree_values),
        out_shape=jax.ShapeDtypeStruct((rows, D), out_dtype),
        grid=grid,
        in_specs=[
            pl.BlockSpec((row_tile, L), lambda i: (i, 0)),        # x rows
            pl.BlockSpec((L, big_w), lambda i: (0, 0)),           # merged x-RHS
            pl.BlockSpec((1, n_rff), lambda i: (0, 0)),           # fused biases
            pl.BlockSpec((n_rff, D), lambda i: (0, 0)),           # W.T rows: rff
            pl.BlockSpec((n_poly, D), lambda i: (0, 0)),          # W.T rows: poly
        ],
        out_specs=pl.BlockSpec((row_tile, D), lambda i: (i, 0)),
        compiler_params=pltpu.CompilerParams(
            dimension_semantics=("parallel",),
            vmem_limit_bytes=32 * 1024 * 1024,
        ),
    )(x2d, wbig, fb2, wrff, wpp)

    return out2d.reshape(x.shape[:-1] + (D,))


def _reference(x, patch_indices, freq_weights, freq_biases, proj_weight):
    hp = jax.lax.Precision.HIGHEST
    poly_feats = [jnp.prod(x[..., jnp.asarray(pis)], axis=-1)
                  for pis in patch_indices]
    weighted = jnp.matmul(x, freq_weights, precision=hp) + freq_biases
    rff = jnp.concatenate([jnp.sin(weighted), jnp.cos(weighted)], axis=-1)
    feats = jnp.concatenate([x, *poly_feats, rff], axis=-1)
    return jnp.matmul(feats, proj_weight.T, precision=hp)


if __name__ == "__main__":
    # Small config consistent with the module:
    #   patch_length=16, poly_degrees=2 (degrees 2, 3), num_poly_feats=8,
    #   num_rff=96  ->  d_model = 16 + 16 + 96 = 128 (lane-dense output).
    batch, channels, num_patches, patch_length = 2, 4, 8, 16
    poly_degrees, num_poly_feats, num_rff = 2, 8, 96
    rff_scale = 1.0
    d_model = patch_length + poly_degrees * num_poly_feats + num_rff

    key = jax.random.PRNGKey(0)
    kx, kw, kb, kp, *kidx = jax.random.split(key, 4 + poly_degrees)

    x = jax.random.normal(kx, (batch, channels, num_patches, patch_length),
                          dtype=jnp.float32)
    patch_indices = [
        jax.random.randint(k, (num_poly_feats, d), 0, patch_length)
        for d, k in zip(range(2, 2 + poly_degrees), kidx)
    ]
    freq_weights = rff_scale * jax.random.normal(
        kw, (patch_length, num_rff // 2), dtype=jnp.float32)
    freq_biases = jax.random.normal(kb, (1, 1, 1, num_rff // 2),
                                    dtype=jnp.float32)
    bound = 1.0 / np.sqrt(d_model)
    proj_weight = jax.random.uniform(kp, (d_model, d_model), dtype=jnp.float32,
                                     minval=-bound, maxval=bound)

    out = patchtst_kernel_embedding(x, patch_indices, freq_weights,
                                    freq_biases, proj_weight)
    out = jax.block_until_ready(out)

    ref = _reference(x, patch_indices, freq_weights, freq_biases, proj_weight)
    assert out.shape == (batch, channels, num_patches, d_model), out.shape
    assert jnp.allclose(out, ref, atol=2e-2, rtol=2e-2), (
        "mismatch vs reference: max abs diff "
        f"{float(jnp.max(jnp.abs(out - ref)))}")

    print("KERNEL_OK")
</pallas_src>

<mosaic_0001>
module attributes {stable_mosaic.version = 11 : i64} {
  func.func @_embedding_kernel(%arg0: i32, %arg1: memref<32x16xf32, #tpu.memory_space<vmem>>, %arg2: memref<16x384xf32, #tpu.memory_space<vmem>>, %arg3: memref<1x96xf32, #tpu.memory_space<vmem>>, %arg4: memref<96x128xf32, #tpu.memory_space<vmem>>, %arg5: memref<16x128xf32, #tpu.memory_space<vmem>>, %arg6: memref<32x128xf32, #tpu.memory_space<vmem>>) attributes {dimension_semantics = [#tpu.dimension_semantics<parallel>], iteration_bounds = array<i64: 2>, scalar_prefetch = 0 : i64, scratch_operands = 0 : i64, tpu.core_type = #tpu.core_type<tc>, window_params = [{transform_indices = @transform_0, window_bounds = array<i64: 32, 16>}, {pipeline_mode = #tpu.pipeline_mode<synchronous>, transform_indices = @transform_1, window_bounds = array<i64: 16, 384>}, {pipeline_mode = #tpu.pipeline_mode<synchronous>, transform_indices = @transform_2, window_bounds = array<i64: 1, 96>}, {pipeline_mode = #tpu.pipeline_mode<synchronous>, transform_indices = @transform_3, window_bounds = array<i64: 96, 128>}, {pipeline_mode = #tpu.pipeline_mode<synchronous>, transform_indices = @transform_4, window_bounds = array<i64: 16, 128>}, {transform_indices = @transform_5, window_bounds = array<i64: 32, 128>}]} {
    %c0 = arith.constant 0 : index
    %c0_0 = arith.constant 0 : index
    %0 = vector.load %arg1[%c0, %c0_0] : memref<32x16xf32, #tpu.memory_space<vmem>>, vector<32x16xf32>
    %c0_1 = arith.constant 0 : index
    %c0_2 = arith.constant 0 : index
    %1 = vector.load %arg2[%c0_1, %c0_2] : memref<16x384xf32, #tpu.memory_space<vmem>>, vector<16x384xf32>
    %cst = arith.constant dense<0.000000e+00> : vector<32x384xf32>
    %2 = tpu.matmul %0, %1, %cst {dimension_numbers = #tpu.dot_dimension_numbers<[1], [0], [0], [1], [0, 0, 1, 1], [], []>} : vector<32x16xf32>, vector<16x384xf32>, vector<32x384xf32> -> vector<32x384xf32>
    %3 = vector.extract_strided_slice %2 {offsets = [0, 0], sizes = [32, 128], strides = [1, 1]} : vector<32x384xf32> to vector<32x128xf32>
    %4 = vector.extract_strided_slice %2 {offsets = [0, 128], sizes = [32, 96], strides = [1, 1]} : vector<32x384xf32> to vector<32x96xf32>
    %c0_3 = arith.constant 0 : index
    %c0_4 = arith.constant 0 : index
    %5 = vector.load %arg3[%c0_3, %c0_4] : memref<1x96xf32, #tpu.memory_space<vmem>>, vector<1x96xf32>
    %6 = vector.broadcast %5 : vector<1x96xf32> to vector<32x96xf32>
    %7 = arith.addf %4, %6 : vector<32x96xf32>
    %8 = math.sin %7 : vector<32x96xf32>
    %c0_5 = arith.constant 0 : index
    %c0_6 = arith.constant 0 : index
    %9 = vector.load %arg4[%c0_5, %c0_6] : memref<96x128xf32, #tpu.memory_space<vmem>>, vector<96x128xf32>
    %cst_7 = arith.constant dense<0.000000e+00> : vector<32x128xf32>
    %10 = tpu.matmul %8, %9, %cst_7 {dimension_numbers = #tpu.dot_dimension_numbers<[1], [0], [0], [1], [0, 0, 1, 1], [], []>} : vector<32x96xf32>, vector<96x128xf32>, vector<32x128xf32> -> vector<32x128xf32>
    %11 = arith.addf %3, %10 : vector<32x128xf32>
    %12 = vector.extract_strided_slice %2 {offsets = [0, 256], sizes = [32, 16], strides = [1, 1]} : vector<32x384xf32> to vector<32x16xf32>
    %13 = vector.extract_strided_slice %2 {offsets = [0, 272], sizes = [32, 16], strides = [1, 1]} : vector<32x384xf32> to vector<32x16xf32>
    %14 = arith.mulf %12, %13 : vector<32x16xf32>
    %15 = tpu.iota {dimensions = array<i32: 1>} : vector<32x16xi32>
    %c8_i32 = arith.constant 8 : i32
    %16 = vector.broadcast %c8_i32 : i32 to vector<32x16xi32>
    %17 = arith.cmpi sge, %15, %16 : vector<32x16xi32>
    %18 = vector.extract_strided_slice %2 {offsets = [0, 288], sizes = [32, 16], strides = [1, 1]} : vector<32x384xf32> to vector<32x16xf32>
    %19 = arith.mulf %14, %18 : vector<32x16xf32>
    %20 = arith.select %17, %19, %14 : vector<32x16xi1>, vector<32x16xf32>
    %c0_8 = arith.constant 0 : index
    %c0_9 = arith.constant 0 : index
    %21 = vector.load %arg5[%c0_8, %c0_9] : memref<16x128xf32, #tpu.memory_space<vmem>>, vector<16x128xf32>
    %cst_10 = arith.constant dense<0.000000e+00> : vector<32x128xf32>
    %22 = tpu.matmul %20, %21, %cst_10 {dimension_numbers = #tpu.dot_dimension_numbers<[1], [0], [0], [1], [0, 0, 1, 1], [], []>} : vector<32x16xf32>, vector<16x128xf32>, vector<32x128xf32> -> vector<32x128xf32>
    %23 = arith.addf %11, %22 : vector<32x128xf32>
    %c0_11 = arith.constant 0 : index
    %c0_12 = arith.constant 0 : index
    %24 = vector.load %arg6[%c0_11, %c0_12] : memref<32x128xf32, #tpu.memory_space<vmem>>, vector<32x128xf32>
    tpu.vector_store %arg6[%c0_11, %c0_12], %23 {strides = array<i32>} : memref<32x128xf32, #tpu.memory_space<vmem>>, vector<32x128xf32>,
    return
  }
  func.func @transform_0(%arg0: i32) -> (i32, i32) {
    %c0_i32 = arith.constant 0 : i32
    %c0_i32_0 = arith.constant 0 : i32
    return %arg0, %c0_i32 : i32, i32
  }
  func.func @transform_1(%arg0: i32) -> (i32, i32) {
    %c0_i32 = arith.constant 0 : i32
    %c0_i32_0 = arith.constant 0 : i32
    %c0_i32_1 = arith.constant 0 : i32
    return %c0_i32, %c0_i32_0 : i32, i32
  }
  func.func @transform_2(%arg0: i32) -> (i32, i32) {
    %c0_i32 = arith.constant 0 : i32
    %c0_i32_0 = arith.constant 0 : i32
    %c0_i32_1 = arith.constant 0 : i32
    return %c0_i32, %c0_i32_0 : i32, i32
  }
  func.func @transform_3(%arg0: i32) -> (i32, i32) {
    %c0_i32 = arith.constant 0 : i32
    %c0_i32_0 = arith.constant 0 : i32
    %c0_i32_1 = arith.constant 0 : i32
    return %c0_i32, %c0_i32_0 : i32, i32
  }
  func.func @transform_4(%arg0: i32) -> (i32, i32) {
    %c0_i32 = arith.constant 0 : i32
    %c0_i32_0 = arith.constant 0 : i32
    %c0_i32_1 = arith.constant 0 : i32
    return %c0_i32, %c0_i32_0 : i32, i32
  }
  func.func @transform_5(%arg0: i32) -> (i32, i32) {
    %c0_i32 = arith.constant 0 : i32
    %c0_i32_0 = arith.constant 0 : i32
    return %arg0, %c0_i32 : i32, i32
  }
}

</mosaic_0001>

<bundles_post_ra>
// kernel: tpu_custom_call.1
= control target key start
LH: loop header
LB: loop body
LE: loop exit
PB: predicated region body
PF: predicated region fallthrough
CT: control target
= control target key end

     0   :  { %10 = vsyncpa [#allocation3], 0  ;;  %s2256_s0 = inlined_call_operand.vmem [shape: f32[64,16], index: 0, kind: input, shape index: {}]   ;;  %s2257_s1 = inlined_call_operand.vmem [shape: f32[16,384], index: 1, kind: input, shape index: {}]   ;;  %s2258_s2 = inlined_call_operand.vmem [shape: f32[1,96], index: 2, kind: input, shape index: {}]   ;;  %s2259_s3 = inlined_call_operand.hbm [shape: f32[96,128], index: 3, kind: input, shape index: {}]   ;;  %s2260_s4 = inlined_call_operand.vmem [shape: f32[16,128], index: 4, kind: input, shape index: {}]   ;;  %s2261_s5 = inlined_call_operand.hbm [shape: f32[64,128], index: 5, kind: output, shape index: {}]  }
   0x1   :  { %11 = vsyncpa [#allocation4], 0 }
   0x2   :  { %13 = vsyncpa [#allocation4 + $0x1], 0  ;;  %s1478_s18 = smov 0   ;;  %s1480_s19 = smov 0  }
   0x3   :  { %s1482_s20 = smov 0   ;;  %s1484_s21 = smov 0  }
   0x4 LB: > { %s1499_s22 = sadd.s32 4294967295, %s1432_s21   ;;  %s1223_s23 = sadd.s32 4294967294, %s1432_s21   ;;  %s1432_s21 = sphi %s1484_s21, %s2300_s21   ;;  %s1428_s20 = sphi %s1482_s20, %s2299_s20   ;;  %s1424_s19 = sphi %s1480_s19, %s2298_s19   ;;  %s1420_s18 = sphi %s1478_s18, %s2297_s18  }
   0x5   : > { %s1503_s24 = sadd.s32 1, %s1432_s21   ;;  %s136_s25 = sadd.s32 1, %s1428_s20 }
   0x6   : > { %s133_s26 = ssub.s32 %s1432_s21, %s1503_s24  ;;  %p146_p0 = scmp.ne.s32.totalorder %s1428_s20, %s1424_s19 }
   0x7   : > { %p134_p1 = scmp.eq.s32.totalorder %s133_s26, 0  ;;  %p147_p2 = scmp.eq.s32.totalorder %s1499_s22, 1 }
   0x8   : > { %p152_p3 = scmp.ne.s32.totalorder %s1424_s19, %s1420_s18  ;;  %p153_p4 = scmp.eq.s32.totalorder %s1223_s23, 1 }
   0x9   : > { %s1514_s27 = scalar_select %p134_p1, %s1428_s20, %s136_s25  }
   0xa   : > { %p1516_p5 = por %p147_p2, %p146_p0  ;;  %p1520_p6 = por %p153_p4, %p152_p3 }
   0xb   : > { %p1224_p7 = scmp.ge.s32.totalorder %s1432_s21, 1  ;;  %p160_p8 = scmp.lt.s32.totalorder %s1432_s21, 3 }
   0xc   : > { %p1286_p9 = scmp.eq.s32.totalorder %s1499_s22, 0  ;;  %s177_s7 = sshll.u32 %s2259_s3, 4  ;;  %s178_s7 = int_to_ptr.hbm [resolvable:$true] %s177_s7 }
   0xd   : > { %p161_p10 = pnand %p1224_p7, %p160_p8  ;;  %s1434_s8 = smov [#allocation2]  }
   0xe   : > { %s179_s9 = sshll.u32 %s1434_s8, 4  ;;  %s1435_s10 = smov 128   ;;  %s180_s9 = int_to_ptr.vmem [resolvable:$true] %s179_s9 }
   0xf   : > { %p1278_p11 = pneg %p161_p10  ;;  %s1436_s11 = smov 8  }
  0x10   : > { %207 = sbr.rel (%p161_p10) target bundleno = 512 (0x200), region = 40 }
  0x11   : > { %p1279_p12 = pnand %p1286_p9, %p1278_p11 }
  0x13   : > { %1281 = dma.hbm_to_vmem [thread:$0]  (!%p1279_p12), %s178_s7, 1536, %s180_s9, [#allocation3], %s1435_s10, %s1435_s10, %s1436_s11  }
  0x15   : > { %1411 = dma.done.wait (%p1286_p9), [#allocation3], 1536  }
  0x16   : > { %1413 = vsyncadd (%p1286_p9), [#allocation3], 4294965760  ;;  %s1230_s12 = sshll.u32 %s1499_s22, 2  ;;  %v250_v0 = vld [vmem:[%s2257_s1 + $0x18] sm:$0xff]  ;;  %v252_v1 = vld [vmem:[%s2257_s1 + $0x28] sm:$0xff]  ;;  %vm253_vm0 = vcmask 130048  }
  0x17   : > { %p237_p13 = scmp.lt.s32.totalorder %s1230_s12, 7  ;;  %v247_v2 = vld [vmem:[%s2257_s1] sm:$0xff]  ;;  %1270 = vmatpush.msra.mxu1 %v250_v0  ;;  %338 = vmatpush.msra.mxu2 %v252_v1  ;;  %v249_v3 = vld [vmem:[%s2257_s1 + $0x10] sm:$0xff]  ;;  %v248_v7 = vld [vmem:[%s2257_s1 + $0x8] sm:$0xff]  ;;  %v2266_v37 = vmov 683565275  }
  0x18   : > { %v251_v6 = vld [vmem:[%s2257_s1 + $0x20] sm:$0xff]  ;;  %280 = vmatpush.msra.mxu0 %v250_v0  ;;  %v1440_v39 = vmov 2475754826   ;;  %v1441_v42 = vmov 2131351028   ;;  %v992_v0 = vld [vmem:[#allocation2 + $0x58] sm:$0xff] }
  0x19   : > { %s2302_s12 = smov (!%p237_p13, %s1230_s12), 7  ;;  %1271 = vmatpush.msra.mxu1 %v247_v2  ;;  %339 = vmatpush.msra.mxu2 %v249_v3  ;;  %v1581_v13 = vld [vmem:[%s2258_s2] ss:$0 sm:$0xff]  ;;  %v1442_v45 = vmov 920167782   ;;  %v991_v1 = vld [vmem:[#allocation2 + $0x50] sm:$0xff] }
  0x1a   : > { %s1231_s13 = sshll.u32 %s2302_s12, 3  ;;  %281 = vmatpush.msra.mxu0 %v247_v2  ;;  %v1443_v47 = vmov 1326507024   ;;  %v1444_v53 = vmov 2102212464   ;;  %1010 = vmatpush.msra.mxu3 %v992_v0  ;;  %s233_s30 = sand.u32 1, %s1424_s19  }
  0x1b   : > { %s240_s16 = scalar_lea.vmem %s2256_s0, %s1231_s13  ;;  %309 = vmatpush.msrb.mxu1 %v251_v6  ;;  %s1437_s13 = smov 112   ;;  %v990_v6 = vld [vmem:[#allocation2 + $0x48] sm:$0xff] }
  0x1c   : > { %v245_v4 = vld [vmem:[%s240_s16 + $0x10] sm:$0xff]  ;;  %v243_v5 = vld [vmem:[%s240_s16] sm:$0xff]  ;;  %v246_v8 = vld [vmem:[%s240_s16 + $0x18] sm:$0xff]  ;;  %1011 = vmatpush.msra.mxu3 %v991_v1  ;;  %s1229_s6 = sshll.u32 %s233_s30, 5  ;;  %s1269_s8 = sshll.u32 %s1499_s22, 5 }
  0x1d   : > { %1234 = vmatmul.msk.f32.vlgmr.msra.gmra.mxu1 %vm253_vm0, %v245_v4  ;;  %1240 = vmatmul.msk.f32.vlgmr.msra.gmra.mxu2 %vm253_vm0, %v243_v5  ;;  %v244_v9 = vld [vmem:[%s240_s16 + $0x8] sm:$0xff]  ;;  %s1438_s16 = smov 96   ;;  %s235_s7 = scalar_lea.vmem [#allocation5], %s1229_s6 }
  0x1e   : > { %1232 = vmatmul.msk.f32.vlgmr.msra.gmra.mxu0 %vm253_vm0, %v243_v5  ;;  %310 = vmatpush.msrb.mxu1 %v248_v7  ;;  %s1145_s11 = scalar_lea.hbm %s2261_s5, %s1269_s8  ;;  %s1146_s12 = sshll.u32 %s235_s7, 4  ;;  %s1147_s12 = int_to_ptr.vmem [resolvable:$true] %s1146_s12 }
  0x1f   : > { %1012 = vmatpush.msra.mxu3 %v990_v6  ;;  %s1134_s14 = scalar_lea.sflag [#allocation4], %s233_s30  ;;  %s1386_s23 = scalar_lea.hbm %s2261_s5, 64 }
  0x25   : > { %1235 = vmatmul.msk.f32.gmra.mxu1 %vm253_vm0, %v246_v8  ;;  %1241 = vmatmul.msk.f32.gmra.mxu2 %vm253_vm0, %v244_v9 }
  0x26   : > { %1233 = vmatmul.msk.f32.gmra.mxu0 %vm253_vm0, %v244_v9 }
  0x2d   : > { %1236 = vmatmul.msk.f32.vlgmr.msrb.gmra.mxu1 %vm253_vm0, %v243_v5  ;;  %1242 = vmatmul.msk.f32.gmra.mxu2 %vm253_vm0, %v245_v4 }
  0x35   : > { %1237 = vmatmul.msk.f32.gmra.mxu1 %vm253_vm0, %v244_v9  ;;  %1243 = vmatmul.msk.f32.gmra.mxu2 %vm253_vm0, %v246_v8 }
  0x3d   : > { %1238 = vmatmul.msk.f32.gmra.mxu1 %vm253_vm0, %v245_v4 }
  0x45   : > { %1239 = vmatmul.msk.f32.gmra.mxu1 %vm253_vm0, %v246_v8 }
  0x9a   : > { %v1570_v10 = vpop.f32.mrf.mxu1 }
  0x9b   : > { %2275 = vst [vmem:[#allocation8_spill] sm:$0xff] %v1570_v10 }
  0xa0   : > { %v1572_v11 = vpop.f32.mrf.mxu2 }
  0xa1   : > { %1043 = vrot.lane.b32.xlu0 %v1572_v11, %s1437_s13 }
  0xa2   : > { %v1576_v12 = vpop.f32.mrf.mxu1 }
  0xa3   : > { %2276 = vst [vmem:[#allocation9_spill] sm:$0xff] %v1576_v12 }
  0xa8   : > { %v1583_v14 = vpop.f32.mrf.mxu2 }
  0xa9   : > { %1062 = vrot.lane.b32.xlu0 %v1572_v11, %s1438_s16  ;;  %1045 = vrot.lane.b32.xlu1 %v1583_v14, %s1437_s13 }
  0xaa   : > { %v312_v15 = vpop.f32.mrf.mxu1 }
  0xab   : > { %v1589_v16 = vadd.f32 %v1581_v13, %v312_v15 }
  0xad   : > { %v364_v17 = vand.u32 2139095040, %v1589_v16  ;;  %v2265_v22 = vand.u32 2147483647, %v1589_v16 }
  0xaf   : > { %v365_v18 = vshrl.u32 %v364_v17, 23  ;;  %v368_v27 = vand.u32 8388607, %v2265_v22 }
  0xb0   : > { %v1592_v19 = vpop.f32.mrf.mxu2 }
  0xb1   : > { %v1244_v20 = vadd.s32 4294967169, %v365_v18  ;;  %1064 = vrot.lane.b32.xlu1 %v1583_v14, %s1438_s16  ;;  %1047 = vrot.lane.b32.xlu2 %v1592_v19, %s1437_s13  ;;  %v369_v33 = vor.u32 8388608, %v368_v27 }
  0xb2   : > { %v315_v21 = vpop.f32.mrf.mxu1 }
  0xb3   : > { %v371_v23 = vadd.s32 1, %v1244_v20  ;;  %v1599_v24 = vadd.f32 %v1581_v13, %v315_v21  ;;  %v1627_v51 = vshll.u32 %v369_v33, 8 }
  0xb5   : > { %vm372_vm1 = vcmp.gt.s32.totalorder %v371_v23, 0  ;;  %v519_v26 = vand.u32 2139095040, %v1599_v24  ;;  %v2264_v29 = vand.u32 2147483647, %v1599_v24  ;;  %v1647_v3 = vand.u32 65535, %v1627_v51 }
  0xb6   : > { %v373_v25 = vsel %vm372_vm1, %v371_v23, 0  ;;  %v1650_v4 = vshrl.u32 %v1627_v51, 16 }
  0xb7   : > { %v375_v28 = vand.u32 31, %v373_v25  ;;  %v520_v30 = vshrl.u32 %v519_v26, 23  ;;  %v523_v36 = vand.u32 8388607, %v2264_v29  ;;  %v1621_v44 = vshrl.u32 %v373_v25, 5  ;;  %v989_v25 = vld [vmem:[#allocation2 + $0x40] sm:$0xff] }
  0xb8   : > { %v1605_v31 = vpop.f32.mrf.mxu2  ;;  %1013 = vmatpush.msra.mxu3 %v989_v25 }
  0xb9   : > { %2277 = vst [vmem:[#allocation10_spill] sm:$0xff] %v1605_v31  ;;  %v1607_v32 = vsub.s32 32, %v375_v28  ;;  %1066 = vrot.lane.b32.xlu2 %v1592_v19, %s1438_s16  ;;  %1049 = vrot.lane.b32.xlu0 %v1605_v31, %s1437_s13  ;;  %v1247_v35 = vadd.s32 4294967169, %v520_v30  ;;  %v378_v38 = vshll.u32 %v2266_v37, %v375_v28  ;;  %v381_v41 = vshll.u32 %v1440_v39, %v375_v28  ;;  %s1148_s13 = sshll.u32 %s1145_s11, 4  ;;  %s1149_s13 = int_to_ptr.hbm [resolvable:$true] %s1148_s13 }
  0xba   : > { %1068 = vrot.lane.b32.xlu1 %v1605_v31, %s1438_s16  ;;  %v318_v34 = vpop.f32.mrf.mxu1  ;;  %v390_v46 = vshll.u32 %v1442_v45, %v375_v28  ;;  %v384_v50 = vshll.u32 %v1441_v42, %v375_v28  ;;  %v387_v55 = vshll.u32 %v1444_v53, %v375_v28  ;;  %v524_v59 = vor.u32 8388608, %v523_v36  ;;  %s1380_s15 = sshra.s32 %s1149_s13, 4  ;;  %s1381_s15 = int_to_ptr.hbm [resolvable:$true] %s1380_s15 }
  0xbb   : > { %v379_v40 = vshrl.u32 %v1440_v39, %v1607_v32  ;;  %v382_v43 = vshrl.u32 %v1441_v42, %v1607_v32  ;;  %v391_v48 = vshrl.u32 %v1443_v47, %v1607_v32  ;;  %v526_v49 = vadd.s32 1, %v1247_v35  ;;  %s1382_s16 = scalar_lea.hbm %s1381_s15, 32  ;;  %p1387_p3 = scmp.lt.s32.totalorder %s1381_s15, %s2261_s5 }
  0xbc   : > { %v1630_v52 = vadd.f32 %v1581_v13, %v318_v34  ;;  %v385_v54 = vshrl.u32 %v1444_v53, %v1607_v32  ;;  %v388_v56 = vshrl.u32 %v1442_v45, %v1607_v32  ;;  %vm393_vm3 = vcmp.lt.s32.totalorder %v1621_v44, 1  ;;  %p1383_p0 = scmp.ne.s32.totalorder %s1381_s15, %s1382_s16  ;;  %p1388_p4 = scmp.lt.s32.totalorder %s1386_s23, %s1382_s16 }
  0xbd   : > { %vm527_vm2 = vcmp.gt.s32.totalorder %v526_v49, 0  ;;  %v1637_v57 = vor.u32 %v379_v40, %v378_v38  ;;  %v1639_v58 = vor.u32 %v382_v43, %v381_v41  ;;  %v392_v61 = vor.u32 %v391_v48, %v390_v46  ;;  %v988_v38 = vld [vmem:[#allocation2 + $0x38] sm:$0xff] }
  0xbe   : > { %v528_v60 = vsel %vm527_vm2, %v526_v49, 0  ;;  %v2263_v63 = vand.u32 2147483647, %v1630_v52  ;;  %vm396_vm4 = vcmp.lt.s32.totalorder %v1621_v44, 4  ;;  %v674_v2 = vand.u32 2139095040, %v1630_v52  ;;  %1014 = vmatpush.msra.mxu3 %v988_v38  ;;  %p1384_p1 = pnand %p1383_p0, %p1516_p5  ;;  %p1389_p7 = por %p1388_p4, %p1387_p3 }
  0xbf   : > { %v530_v62 = vand.u32 31, %v528_v60  ;;  %vm395_vm5 = vcmp.lt.s32.totalorder %v1621_v44, 3  ;;  %v1654_v7 = vor.u32 %v385_v54, %v384_v50  ;;  %v389_v8 = vor.u32 %v388_v56, %v387_v55  ;;  %v987_v50 = vld [vmem:[#allocation2 + $0x30] sm:$0xff] }
  0xc0   : > { %v1660_v9 = vsel %vm393_vm3, %v1637_v57, %v1639_v58  ;;  %v1662_v15 = vshll.u32 %v524_v59, 8  ;;  %v406_v18 = vsel %vm396_vm4, %v392_v61, 1326507024  ;;  %v1666_v20 = vshrl.u32 %v528_v60, 5  ;;  %1015 = vmatpush.msra.mxu3 %v987_v50  ;;  %p1385_p2 = pneg %p1384_p1 }
  0xc1   : > { %v1652_v5 = vsub.s32 32, %v530_v62  ;;  %v542_v21 = vshll.u32 %v1444_v53, %v530_v62  ;;  %v678_v23 = vand.u32 8388607, %v2263_v63  ;;  %v545_v27 = vshll.u32 %v1442_v45, %v530_v62 }
  0xc2   : > { %v321_v17 = vpop.f32.mrf.mxu1  ;;  %v675_v30 = vshrl.u32 %v674_v2, 23  ;;  %v533_v33 = vshll.u32 %v2266_v37, %v530_v62  ;;  %v536_v34 = vshll.u32 %v1440_v39, %v530_v62  ;;  %v539_v35 = vshll.u32 %v1441_v42, %v530_v62  ;;  %v986_v62 = vld [vmem:[#allocation2 + $0x28] sm:$0xff]  ;;  %p1390_p8 = pnand %p1389_p7, %p1385_p2 }
  0xc3   : > { %v543_v26 = vshrl.u32 %v1442_v45, %v1652_v5  ;;  %v546_v28 = vshrl.u32 %v1443_v47, %v1652_v5  ;;  %v1680_v36 = vadd.f32 %v1581_v13, %v321_v17  ;;  %v534_v40 = vshrl.u32 %v1440_v39, %v1652_v5  ;;  %1016 = vmatpush.msra.mxu3 %v986_v62 }
  0xc4   : > { %v537_v41 = vshrl.u32 %v1441_v42, %v1652_v5  ;;  %v540_v43 = vshrl.u32 %v1444_v53, %v1652_v5  ;;  %v1250_v46 = vadd.s32 4294967169, %v675_v30  ;;  %v402_v48 = vsel %vm396_vm4, %v389_v8, 920167782  ;;  %v984_v30 = vld [vmem:[#allocation2 + $0x18] sm:$0xff] }
  0xc5   : > { %2278 = vst [vmem:[#allocation11_spill] sm:$0xff] %v1680_v36  ;;  %v405_v13 = vsel %vm393_vm3, %v1639_v58, %v1654_v7  ;;  %v679_v49 = vor.u32 8388608, %v678_v23  ;;  %v377_v54 = vshrl.u32 %v2266_v37, %v1607_v32  ;;  %v407_v55 = vsel %vm395_vm5, %v389_v8, %v406_v18  ;;  %v985_v18 = vld [vmem:[#allocation2 + $0x20] sm:$0xff] }
  0xc6   : > { %v544_v56 = vor.u32 %v543_v26, %v542_v21  ;;  %v547_v59 = vor.u32 %v546_v28, %v545_v27  ;;  %v681_v60 = vadd.s32 1, %v1250_v46  ;;  %vm548_vm6 = vcmp.lt.s32.totalorder %v1666_v20, 1  ;;  %1017 = vmatpush.msra.mxu3 %v985_v18 }
  0xc7   : > { %vm551_vm7 = vcmp.lt.s32.totalorder %v1666_v20, 4  ;;  %v829_v61 = vand.u32 2139095040, %v1680_v36  ;;  %vm394_vm8 = vcmp.lt.s32.totalorder %v1621_v44, 2  ;;  %v1702_v0 = vor.u32 %v534_v40, %v533_v33 }
  0xc8   : > { %v1704_v1 = vor.u32 %v537_v41, %v536_v34  ;;  %v1706_v32 = vor.u32 %v540_v43, %v539_v35  ;;  %vm682_vm9 = vcmp.gt.s32.totalorder %v681_v60, 0  ;;  %v1708_v6 = vshll.u32 %v679_v49, 8  ;;  %1018 = vmatpush.msra.mxu3 %v984_v30 }
  0xc9   : > { %v683_v2 = vsel %vm682_vm9, %v681_v60, 0  ;;  %v2262_v8 = vand.u32 2147483647, %v1680_v36  ;;  %v830_v17 = vshrl.u32 %v829_v61, 23  ;;  %vm550_vm10 = vcmp.lt.s32.totalorder %v1666_v20, 3  ;;  %v982_v60 = vld [vmem:[#allocation2 + $0x8] sm:$0xff] }
  0xca   : > { %v557_v21 = vsel %vm551_vm7, %v544_v56, 920167782  ;;  %v561_v23 = vsel %vm551_vm7, %v547_v59, 1326507024  ;;  %v685_v25 = vand.u32 31, %v683_v2  ;;  %v403_v26 = vsel %vm395_vm5, %v1654_v7, %v402_v48 }
  0xcb   : > { %v1720_v27 = vand.u32 65535, %v1662_v15  ;;  %v1253_v28 = vadd.s32 4294967169, %v830_v17  ;;  %v1724_v33 = vsel %vm394_vm8, %v405_v13, %v407_v55  ;;  %v1730_v34 = vsel %vm548_vm6, %v1702_v0, %v1704_v1 }
  0xcc   : > { %v1733_v35 = vshrl.u32 %v1662_v15, 16  ;;  %v1735_v38 = vsub.s32 32, %v685_v25  ;;  %v1740_v40 = vsel %vm393_vm3, %v377_v54, %v1637_v57  ;;  %v1745_v41 = vsel %vm550_vm10, %v1706_v32, %v557_v21  ;;  %v983_v57 = vld [vmem:[#allocation2 + $0x10] sm:$0xff] }
  0xcd   : > { %v1751_v43 = vsel %vm548_vm6, %v1704_v1, %v1706_v32  ;;  %v1755_v46 = vsel %vm550_vm10, %v544_v56, %v561_v23  ;;  %v1758_v48 = vand.u32 65535, %v1708_v6  ;;  %v1762_v13 = vand.u32 8388607, %v2262_v8  ;;  %1019 = vmatpush.msra.mxu3 %v983_v57 }
  0xce   : > { %v398_v49 = vsel %vm396_vm4, %v1654_v7, 2102212464  ;;  %v1770_v50 = vsel %vm394_vm8, %v1660_v9, %v403_v26  ;;  %v412_v54 = vand.u32 65535, %v1724_v33  ;;  %v688_v55 = vshll.u32 %v2266_v37, %v685_v25 }
  0xcf   : > { %v689_v56 = vshrl.u32 %v1440_v39, %v1735_v38  ;;  %v836_v59 = vadd.s32 1, %v1253_v28  ;;  %v413_v61 = vshrl.u32 %v1724_v33, 16  ;;  %v691_v62 = vshll.u32 %v1440_v39, %v685_v25  ;;  %1020 = vmatpush.msra.mxu3 %v982_v60 }
  0xd0   : > { %v692_v7 = vshrl.u32 %v1441_v42, %v1735_v38  ;;  %v697_v17 = vshll.u32 %v1444_v53, %v685_v25  ;;  %v698_v9 = vshrl.u32 %v1442_v45, %v1735_v38  ;;  %v1783_v18 = vshrl.u32 %v683_v2, 5 }
  0xd1   : > { %vm837_vm11 = vcmp.gt.s32.totalorder %v836_v59, 0  ;;  %v399_v21 = vsel %vm395_vm5, %v1639_v58, %v398_v49  ;;  %v694_v23 = vshll.u32 %v1441_v42, %v685_v25  ;;  %v695_v26 = vshrl.u32 %v1444_v53, %v1735_v38 }
  0xd2   : > { %v1792_v28 = vshll.u32 %v1442_v45, %v685_v25  ;;  %v838_v30 = vsel %vm837_vm11, %v836_v59, 0  ;;  %v1794_v33 = vor.u32 %v689_v56, %v688_v55  ;;  %v701_v2 = vshrl.u32 %v1443_v47, %v1735_v38 }
  0xd3   : > { %v1798_v57 = vshrl.u32 %v838_v30, 5  ;;  %v840_v8 = vand.u32 31, %v838_v30  ;;  %v1800_v63 = vor.u32 %v692_v7, %v691_v62  ;;  %v1802_v58 = vor.u32 %v698_v9, %v697_v17 }
  0xd4   : > { %v414_v49 = vmul.u32 %v412_v54, %v1647_v3  ;;  %v415_v29 = vmul.u32 %v413_v61, %v1647_v3  ;;  %vm703_vm12 = vcmp.lt.s32.totalorder %v1783_v18, 1  ;;  %v1816_v7 = vmul.u32 %v412_v54, %v1650_v4 }
  0xd5   : > { %v1807_v25 = vsub.s32 32, %v840_v8  ;;  %v843_v55 = vshll.u32 %v2266_v37, %v840_v8  ;;  %v846_v56 = vshll.u32 %v1440_v39, %v840_v8  ;;  %v849_v59 = vshll.u32 %v1441_v42, %v840_v8 }
  0xd6   : > { %v852_v60 = vshll.u32 %v1444_v53, %v840_v8  ;;  %v855_v62 = vshll.u32 %v1442_v45, %v840_v8  ;;  %vm858_vm13 = vcmp.lt.s32.totalorder %v1798_v57, 1  ;;  %vm860_vm14 = vcmp.lt.s32.totalorder %v1798_v57, 3 }
  0xd7   : > { %v844_v17 = vshrl.u32 %v1440_v39, %v1807_v25  ;;  %v847_v9 = vshrl.u32 %v1441_v42, %v1807_v25  ;;  %v850_v30 = vshrl.u32 %v1444_v53, %v1807_v25  ;;  %v853_v22 = vshrl.u32 %v1442_v45, %v1807_v25 }
  0xd8   : > { %v856_v8 = vshrl.u32 %v1443_v47, %v1807_v25  ;;  %vm861_vm15 = vcmp.lt.s32.totalorder %v1798_v57, 4  ;;  %v418_v54 = vshll.u32 %v415_v29, 16  ;;  %v417_v53 = vmul.u32 %v413_v61, %v1650_v4 }
  0xd9   : > { %v1830_v37 = vor.u32 %v844_v17, %v843_v55  ;;  %v1832_v39 = vor.u32 %v847_v9, %v846_v56  ;;  %v1834_v12 = vor.u32 %v850_v30, %v849_v59  ;;  %v854_v42 = vor.u32 %v853_v22, %v852_v60 }
  0xda   : > { %v857_v10 = vor.u32 %v856_v8, %v855_v62  ;;  %v420_v45 = vshll.u32 %v1816_v7, 16  ;;  %vm422_vm1 = vc.u32 %v414_v49, %v418_v54  ;;  %v2268_v56 = vmov 0  }
  0xdb   : > { %v1842_v47 = vsel %vm858_vm13, %v1830_v37, %v1832_v39  ;;  %v867_v55 = vsel %vm861_vm15, %v854_v42, 920167782  ;;  %v1850_v22 = vsel %vm858_vm13, %v1832_v39, %v1834_v12  ;;  %v423_v61 = vsel %vm422_vm1, 1, %v2268_v56 }
  0xdc   : > { %v1856_v59 = vsel %vm860_vm14, %v1834_v12, %v867_v55  ;;  %v871_v60 = vsel %vm861_vm15, %v857_v10, 1326507024  ;;  %v424_v62 = vadd.s32 %v418_v54, %v414_v49  ;;  %v425_v17 = vadd.s32 %v423_v61, %v417_v53 }
  0xdd   : > { %v702_v9 = vor.u32 %v701_v2, %v1792_v28  ;;  %v1863_v30 = vsel %vm860_vm14, %v854_v42, %v871_v60  ;;  %v434_v8 = vand.u32 65535, %v1770_v50  ;;  %v435_v56 = vshrl.u32 %v1770_v50, 16 }
  0xde   : > { %vm705_vm2 = vcmp.lt.s32.totalorder %v1783_v18, 3  ;;  %vm706_vm3 = vcmp.lt.s32.totalorder %v1783_v18, 4  ;;  %v1872_v10 = vsel %vm394_vm8, %v1740_v40, %v399_v21  ;;  %vm426_vm4 = vc.u32 %v424_v62, %v420_v45 }
  0xdf   : > { %v2279_v49 = vmov 0   ;;  %v437_v2 = vmul.u32 %v435_v56, %v1647_v3  ;;  %v438_v54 = vmul.u32 %v434_v8, %v1650_v4  ;;  %vm549_vm5 = vcmp.lt.s32.totalorder %v1666_v20, 2 }
  0xe0   : > { %v427_v28 = vsel %vm426_vm4, 1, %v2279_v49  ;;  %v1878_v42 = vor.u32 %v695_v26, %v694_v23  ;;  %v1884_v50 = vsel %vm703_vm12, %v1794_v33, %v1800_v63  ;;  %v419_v44 = vshrl.u32 %v415_v29, 16 }
  0xe1   : > { %v429_v40 = vadd.s32 %v427_v28, %v425_v17  ;;  %v1889_v21 = vsel %vm706_vm3, %v1802_v58, 920167782  ;;  %v716_v53 = vsel %vm706_vm3, %v702_v9, 1326507024  ;;  %v436_v45 = vmul.u32 %v434_v8, %v1647_v3 }
  0xe2   : > { %v440_v23 = vshll.u32 %v437_v2, 16  ;;  %v439_v55 = vmul.u32 %v435_v56, %v1650_v4  ;;  %v559_v29 = vsel %vm549_vm5, %v1730_v34, %v1745_v41  ;;  %v563_v61 = vsel %vm549_vm5, %v1751_v43, %v1755_v46 }
  0xe3   : > { %v430_v26 = vadd.s32 %v429_v40, %v419_v44  ;;  %v442_v60 = vshll.u32 %v438_v54, 16  ;;  %v567_v17 = vand.u32 65535, %v563_v61  ;;  %v1907_v3 = vsel %vm703_vm12, %v1800_v63, %v1878_v42  ;;  %v981_v40 = vld [vmem:[#allocation2] sm:$0xff] }
  0xe4   : > { %vm444_vm8 = vc.u32 %v436_v45, %v440_v23  ;;  %v446_v62 = vadd.s32 %v440_v23, %v436_v45  ;;  %v421_v4 = vshrl.u32 %v1816_v7, 16  ;;  %v568_v34 = vshrl.u32 %v563_v61, 16  ;;  %1021 = vmatpush.msra.mxu3 %v981_v40 }
  0xe5   : > { %v445_v56 = vsel %vm444_vm8, 1, %v2279_v49  ;;  %v717_v41 = vsel %vm705_vm2, %v1802_v58, %v716_v53  ;;  %v589_v46 = vand.u32 65535, %v559_v29  ;;  %v571_v44 = vmul.u32 %v567_v17, %v1733_v35 }
  0xe6   : > { %v447_v43 = vadd.s32 %v445_v56, %v439_v55  ;;  %vm448_vm9 = vc.u32 %v446_v62, %v442_v60  ;;  %v1914_v9 = vadd.s32 %v430_v26, %v421_v4  ;;  %v570_v28 = vmul.u32 %v568_v34, %v1720_v27 }
  0xe7   : > { %v449_v8 = vsel %vm448_vm9, 1, %v2279_v49  ;;  %v441_v7 = vshrl.u32 %v437_v2, 16  ;;  %v454_v23 = vmul.u32 %v1627_v51, %v1872_v10  ;;  %v590_v61 = vshrl.u32 %v559_v29, 16 }
  0xe8   : > { %v451_v45 = vadd.s32 %v449_v8, %v447_v43  ;;  %v443_v58 = vshrl.u32 %v438_v54, 16  ;;  %v1921_v53 = vadd.s32 %v446_v62, %v442_v60  ;;  %v569_v26 = vmul.u32 %v567_v17, %v1720_v27 }
  0xe9   : > { %v573_v55 = vshll.u32 %v570_v28, 16  ;;  %v572_v56 = vmul.u32 %v568_v34, %v1733_v35  ;;  %v592_v31 = vmul.u32 %v590_v61, %v1720_v27  ;;  %v593_v36 = vmul.u32 %v589_v46, %v1733_v35 }
  0xea   : > { %v452_v4 = vadd.s32 %v451_v45, %v441_v7  ;;  %vm456_vm11 = vc.u32 %v1914_v9, %v1921_v53  ;;  %v575_v2 = vshll.u32 %v571_v44, 16  ;;  %v591_v29 = vmul.u32 %v589_v46, %v1720_v27 }
  0xeb   : > { %vm577_vm1 = vc.u32 %v569_v26, %v573_v55  ;;  %v579_v51 = vadd.s32 %v573_v55, %v569_v26  ;;  %v595_v60 = vshll.u32 %v592_v31, 16  ;;  %v594_v17 = vmul.u32 %v590_v61, %v1733_v35 }
  0xec   : > { %v453_v10 = vadd.s32 %v452_v4, %v443_v58  ;;  %v578_v54 = vsel %vm577_vm1, 1, %v2279_v49  ;;  %v597_v34 = vshll.u32 %v593_v36, 16  ;;  %v2280_v7 = vmov 683565275  }
  0xed   : > { %v580_v62 = vadd.s32 %v578_v54, %v572_v56  ;;  %vm581_vm4 = vc.u32 %v579_v51, %v575_v2  ;;  %vm599_vm8 = vc.u32 %v591_v29, %v595_v60  ;;  %v601_v40 = vadd.s32 %v595_v60, %v591_v29 }
  0xee   : > { %v457_v43 = vadd.s32 1, %v453_v10  ;;  %v582_v8 = vsel %vm581_vm4, 1, %v2279_v49  ;;  %v532_v45 = vshrl.u32 %v2280_v7, %v1652_v5  ;;  %v574_v26 = vshrl.u32 %v570_v28, 16 }
  0xef   : > { %v584_v58 = vadd.s32 %v582_v8, %v580_v62  ;;  %v600_v55 = vsel %vm599_vm8, 1, %v2279_v49  ;;  %v553_v35 = vsel %vm551_vm7, %v1706_v32, 2102212464  ;;  %vm603_vm9 = vc.u32 %v601_v40, %v597_v34 }
  0xf0   : > { %v458_v27 = vsel %vm456_vm11, %v457_v43, %v453_v10  ;;  %v602_v46 = vadd.s32 %v600_v55, %v594_v17  ;;  %v576_v4 = vshrl.u32 %v571_v44, 16  ;;  %v604_v2 = vsel %vm603_vm9, 1, %v2279_v49 }
  0xf1   : > { %v459_v61 = vadd.s32 %v458_v27, %v454_v23  ;;  %v585_v56 = vadd.s32 %v584_v58, %v574_v26  ;;  %v713_v5 = vsel %vm705_vm2, %v1878_v42, %v1889_v21  ;;  %v596_v28 = vshrl.u32 %v592_v31, 16 }
  0xf2   : > { %v606_v51 = vadd.s32 %v604_v2, %v602_v46  ;;  %vm704_vm11 = vcmp.lt.s32.totalorder %v1783_v18, 2  ;;  %v552_v32 = vsel %vm548_vm6, %v532_v45, %v1702_v0  ;;  %v554_v44 = vsel %vm550_vm10, %v1704_v1, %v553_v35 }
  0xf3   : > { %v460_v10 = vadd.s32 536870912, %v459_v61  ;;  %v1954_v23 = vadd.s32 %v585_v56, %v576_v4  ;;  %v834_v54 = vor.u32 8388608, %v1762_v13  ;;  %v598_v29 = vshrl.u32 %v593_v36, 16 }
  0xf4   : > { %v607_v60 = vadd.s32 %v606_v51, %v596_v28  ;;  %v718_v31 = vsel %vm704_vm11, %v1907_v3, %v717_v41  ;;  %v1960_v62 = vadd.s32 %v601_v40, %v597_v34  ;;  %v1965_v0 = vsel %vm704_vm11, %v1884_v50, %v713_v5 }
  0xf5   : > { %v461_v21 = vshrl.u32 %v460_v10, 30  ;;  %v722_v17 = vand.u32 65535, %v718_v31  ;;  %v721_v1 = vshrl.u32 %v1708_v6, 16  ;;  %v555_v13 = vsel %vm549_vm5, %v552_v32, %v554_v44 }
  0xf6   : > { %v608_v36 = vadd.s32 %v607_v60, %v598_v29  ;;  %v723_v43 = vshrl.u32 %v718_v31, 16  ;;  %vm363_vm6 = vcmp.lt.s32.totalorder %v1589_v16, 0  ;;  %vm611_vm7 = vc.u32 %v1954_v23, %v1960_v62 }
  0xf7   : > { %v462_v8 = vshll.u32 %v461_v21, 30  ;;  %v1974_v34 = vmul.u32 %v722_v17, %v721_v1  ;;  %v745_v50 = vshrl.u32 %v1965_v0, 16  ;;  %v1977_v40 = vshll.u32 %v834_v54, 8 }
  0xf8   : > { %v612_v3 = vadd.s32 1, %v608_v36  ;;  %v725_v41 = vmul.u32 %v723_v43, %v1758_v48  ;;  %v609_v20 = vmul.u32 %v1662_v15, %v555_v13  ;;  %v687_v26 = vshrl.u32 %v2280_v7, %v1735_v38 }
  0xf9   : > { %v463_v45 = vsub.s32 %v459_v61, %v462_v8  ;;  %v724_v55 = vmul.u32 %v722_v17, %v1758_v48  ;;  %v744_v35 = vand.u32 65535, %v1965_v0  ;;  %v485_v4 = vsub.s32 4, %v461_v21 }
  0xfa   : > { %v613_v58 = vsel %vm611_vm7, %v612_v3, %v608_v36  ;;  %v728_v27 = vshll.u32 %v725_v41, 16  ;;  %v730_v2 = vshll.u32 %v1974_v34, 16  ;;  %v1986_v61 = vmul.u32 %v745_v50, %v1758_v48 }
  0xfb   : > { %vm464_vm10 = vcmp.lt.s32.totalorder %v463_v45, 0  ;;  %v465_v46 = vsub.s32 0, %v463_v45  ;;  %v614_v56 = vadd.s32 %v613_v58, %v609_v20  ;;  %v727_v38 = vmul.u32 %v723_v43, %v721_v1 }
  0xfc   : > { %vm732_vm5 = vc.u32 %v724_v55, %v728_v27  ;;  %v734_v5 = vadd.s32 %v728_v27, %v724_v55  ;;  %v2281_v10 = vand.u32 2147483647, %v1589_v16  ;;  %v708_v54 = vsel %vm706_vm3, %v1878_v42, 2102212464 }
  0xfd   : > { %v466_v15 = vsel %vm464_vm10, %v465_v46, %v463_v45  ;;  %v615_v28 = vadd.s32 536870912, %v614_v56  ;;  %v733_v51 = vsel %vm732_vm5, 1, %v2279_v49  ;;  %v486_v29 = vsel %vm363_vm6, %v485_v4, %v461_v21 }
  0xfe   : > { %vm1991_vm1 = vcmp.le.f32.partialorder %v2281_v10, 0.7853982  ;;  %v467_v44 = vclz %v466_v15  ;;  %vm736_vm4 = vc.u32 %v734_v5, %v730_v2  ;;  %v735_v31 = vadd.s32 %v733_v51, %v727_v38 }
  0xff   : > { %v2000_v60 = vshrl.u32 %v615_v28, 30  ;;  %v746_v0 = vmul.u32 %v744_v35, %v1758_v48  ;;  %v737_v13 = vsel %vm736_vm4, 1, %v2279_v49  ;;  %v748_v36 = vmul.u32 %v744_v35, %v721_v1 }
 0x100   : > { %v1245_v17 = vadd.s32 4294967294, %v467_v44  ;;  %v750_v43 = vshll.u32 %v1986_v61, 16  ;;  %v2006_v8 = vand.u32 65535, %v1977_v40  ;;  %v455_v42 = vadd.s32 %v1921_v53, %v1914_v9 }
 0x101   : > { %v617_v3 = vshll.u32 %v2000_v60, 30  ;;  %v707_v21 = vsel %vm703_vm12, %v687_v26, %v1794_v33  ;;  %v488_v48 = vsel %vm1991_vm1, 0, %v486_v29  ;;  %v709_v20 = vsel %vm705_vm2, %v1800_v63, %v708_v54 }
 0x102   : > { %vm1246_vm3 = vcmp.lt.s32.totalorder %v1245_v17, 0  ;;  %v756_v58 = vadd.s32 %v750_v43, %v746_v0  ;;  %v739_v35 = vadd.s32 %v737_v13, %v735_v31  ;;  %vm754_vm8 = vc.u32 %v746_v0, %v750_v43 }
 0x103   : > { %v470_v55 = vsel %vm1246_vm3, 0, %v1245_v17  ;;  %v2019_v27 = vsub.s32 %v614_v56, %v617_v3  ;;  %v729_v46 = vshrl.u32 %v725_v41, 16  ;;  %v752_v4 = vshll.u32 %v748_v36, 16 }
 0x104   : > { %v471_v9 = vsub.s32 32, %v470_v55  ;;  %v475_v53 = vsub.s32 4294967266, %v470_v55  ;;  %v472_v2 = vshll.u32 %v463_v45, %v470_v55  ;;  %v749_v26 = vmul.u32 %v745_v50, %v721_v1  ;;  %v1083_v50 = vld [vmem:[%s2260_s4 + $0x8] sm:$0xff] }
 0x105   : > { %vm619_vm12 = vcmp.lt.s32.totalorder %v2019_v27, 0  ;;  %v620_v33 = vsub.s32 0, %v2019_v27  ;;  %v755_v63 = vsel %vm754_vm8, 1, %v2279_v49  ;;  %vm758_vm2 = vc.u32 %v756_v58, %v752_v4  ;;  %1110 = vmatpush.msrb.mxu0 %v1083_v50 }
 0x106   : > { %v473_v5 = vshrl.u32 %v455_v42, %v471_v9  ;;  %v476_v15 = vadd.s32 127, %v475_v53  ;;  %v740_v28 = vadd.s32 %v739_v35, %v729_v46  ;;  %v757_v38 = vadd.s32 %v755_v63, %v749_v26 }
 0x107   : > { %v621_v56 = vsel %vm619_vm12, %v620_v33, %v2019_v27  ;;  %v759_v51 = vsel %vm758_vm2, 1, %v2279_v49  ;;  %v2027_v41 = vshrl.u32 %v1977_v40, 16  ;;  %v710_v44 = vsel %vm704_vm11, %v707_v21, %v709_v20 }
 0x108   : > { %v474_v45 = vor.u32 %v473_v5, %v472_v2  ;;  %v477_v10 = vshll.u32 %v476_v15, 23  ;;  %v505_v1 = vadd.s32 3, %v488_v48  ;;  %v610_v54 = vadd.s32 %v1960_v62, %v1954_v23 }
 0x109   : > { %v622_v29 = vclz %v621_v56  ;;  %v731_v31 = vshrl.u32 %v1974_v34, 16  ;;  %v640_v17 = vsub.s32 4, %v2000_v60  ;;  %v751_v13 = vshrl.u32 %v1986_v61, 16 }
 0x10a   : > { %v478_v0 = vor.u32 4788187, %v477_v10  ;;  %v761_v43 = vadd.s32 %v759_v51, %v757_v38  ;;  %v753_v3 = vshrl.u32 %v748_v36, 16  ;;  %v842_v21 = vshrl.u32 %v2280_v7, %v1807_v25 }
 0x10b   : > { %v1248_v18 = vadd.s32 4294967294, %v622_v29  ;;  %v2039_v42 = vadd.s32 %v740_v28, %v731_v31  ;;  %v481_v20 = vcvt.s32.f32 %v474_v45  ;;  %v2043_v23 = vadd.s32 %v756_v58, %v752_v4 }
 0x10c   : > { %v479_v48 = vand.u32 2147483647, %v478_v0  ;;  %v762_v62 = vadd.s32 %v761_v43, %v751_v13  ;;  %vm859_vm11 = vcmp.lt.s32.totalorder %v1798_v57, 2  ;;  %v862_v34 = vsel %vm858_vm13, %v842_v21, %v1830_v37 }
 0x10d   : > { %vm1249_vm9 = vcmp.lt.s32.totalorder %v1248_v18, 0  ;;  %v863_v61 = vsel %vm861_vm15, %v1834_v12, 2102212464  ;;  %vm766_vm7 = vc.u32 %v2039_v42, %v2043_v23  ;;  %v764_v12 = vmul.u32 %v1708_v6, %v710_v44 }
 0x10e   : > { %v482_v36 = vmul.f32 %v481_v20, %v479_v48  ;;  %v625_v55 = vsel %vm1249_vm9, 0, %v1248_v18  ;;  %v763_v35 = vadd.s32 %v762_v62, %v753_v3  ;;  %v864_v25 = vsel %vm860_vm14, %v1832_v39, %v863_v61 }
 0x10f   : > { %v626_v7 = vsub.s32 32, %v625_v55  ;;  %v630_v58 = vsub.s32 4294967266, %v625_v55  ;;  %v2059_v9 = vsel %vm859_vm11, %v862_v34, %v864_v25  ;;  %v627_v53 = vshll.u32 %v2019_v27, %v625_v55 }
 0x110   : > { %v483_v37 = vxor.u32 2147483648, %v482_v36  ;;  %v767_v46 = vadd.s32 1, %v763_v35  ;;  %v2067_v39 = vsel %vm859_vm11, %v1842_v47, %v1856_v59  ;;  %v873_v33 = vsel %vm859_vm11, %v1850_v22, %v1863_v30  ;;  %v1082_v30 = vld [vmem:[%s2260_s4] sm:$0xff] }
 0x111   : > { %v628_v4 = vshrl.u32 %v610_v54, %v626_v7  ;;  %v631_v2 = vadd.s32 127, %v630_v58  ;;  %v877_v5 = vand.u32 65535, %v873_v33  ;;  %v878_v6 = vshrl.u32 %v873_v33, 16  ;;  %1111 = vmatpush.msrb.mxu0 %v1082_v30 }
 0x112   : > { %v484_v26 = vsel %vm363_vm6, %v483_v37, %v482_v36  ;;  %v768_v27 = vsel %vm766_vm7, %v767_v46, %v763_v35  ;;  %vm518_vm13 = vcmp.lt.s32.totalorder %v1599_v24, 0  ;;  %v2284_v22 = vand.u32 2147483647, %v1599_v24 }
 0x113   : > { %v2078_v15 = vsel %vm1991_vm1, %v1589_v16, %v484_v26  ;;  %v629_v63 = vor.u32 %v628_v4, %v627_v53  ;;  %v632_v56 = vshll.u32 %v631_v2, 23  ;;  %v769_v47 = vadd.s32 %v768_v27, %v764_v12  ;;  %v1044_v58 = vpop.permute.xlu0 %1043 }
 0x114   : > { %v489_v57 = vmul.f32 %v2078_v15, %v2078_v15  ;;  %vm2085_vm14 = vcmp.le.f32.partialorder %v2284_v22, 0.7853982  ;;  %v2093_v32 = vmul.u32 %v878_v6, %v2006_v8  ;;  %v641_v38 = vsel %vm518_vm13, %v640_v17, %v2000_v60 }
 0x115   : > { %v633_v28 = vor.u32 4788187, %v632_v56  ;;  %v770_v51 = vadd.s32 536870912, %v769_v47  ;;  %v2099_v45 = vmul.u32 %v877_v5, %v2027_v41  ;;  %v2101_v50 = vand.u32 3, %v505_v1 }
 0x116   : > { %v490_v10 = vmul.f32 -0.001358992, %v489_v57  ;;  %v497_v44 = vmul.f32 -0.00019511016, %v489_v57  ;;  %v883_v54 = vshll.u32 %v2093_v32, 16  ;;  %v636_v31 = vcvt.s32.f32 %v629_v63 }
 0x117   : > { %v634_v29 = vand.u32 2147483647, %v633_v28  ;;  %v2104_v0 = vshrl.u32 %v770_v51, 30  ;;  %v879_v13 = vmul.u32 %v877_v5, %v2006_v8  ;;  %v643_v60 = vsel %vm2085_vm14, 0, %v641_v38 }
 0x118   : > { %v491_v43 = vadd.f32 0.041655596, %v490_v10  ;;  %v498_v18 = vadd.f32 0.008332121, %v497_v44  ;;  %v882_v17 = vmul.u32 %v878_v6, %v2027_v41  ;;  %v885_v1 = vshll.u32 %v2099_v45, 16 }
 0x119   : > { %v637_v3 = vmul.f32 %v636_v31, %v634_v29  ;;  %v772_v21 = vshll.u32 %v2104_v0, 30  ;;  %vm887_vm15 = vc.u32 %v879_v13, %v883_v54  ;;  %v889_v34 = vadd.s32 %v883_v54, %v879_v13 }
 0x11a   : > { %v492_v48 = vmul.f32 %v491_v43, %v489_v57  ;;  %v499_v20 = vmul.f32 %v498_v18, %v489_v57  ;;  %v888_v62 = vsel %vm887_vm15, 1, %v2279_v49  ;;  %v660_v36 = vadd.s32 3, %v643_v60 }
 0x11b   : > { %v638_v61 = vxor.u32 2147483648, %v637_v3  ;;  %v2113_v55 = vsub.s32 %v769_v47, %v772_v21  ;;  %v890_v7 = vadd.s32 %v888_v62, %v882_v17  ;;  %vm891_vm6 = vc.u32 %v889_v34, %v885_v1  ;;  %v1063_v1 = vpop.permute.xlu0 %1062 }
 0x11c   : > { %v493_v35 = vadd.f32 -0.4999988, %v492_v48  ;;  %v500_v25 = vadd.f32 -0.16666654, %v499_v20  ;;  %vm508_vm10 = vcmp.eq.s32.totalorder %v2101_v50, 0  ;;  %vm507_vm1 = vcmp.lt.s32.totalorder %v2101_v50, 2 }
 0x11d   : > { %v639_v37 = vsel %vm518_vm13, %v638_v61, %v637_v3  ;;  %vm774_vm5 = vcmp.lt.s32.totalorder %v2113_v55, 0  ;;  %v775_v53 = vsub.s32 0, %v2113_v55  ;;  %v892_v2 = vsel %vm891_vm6, 1, %v2279_v49 }
 0x11e   : > { %v494_v12 = vmul.f32 %v493_v35, %v489_v57  ;;  %v501_v46 = vmul.f32 %v500_v25, %v489_v57  ;;  %v2124_v4 = vsel %vm2085_vm14, %v1599_v24, %v639_v37  ;;  %vm504_vm4 = vweird.f32 %v1589_v16 }
 0x11f   : > { %vm511_vm3 = vcmp.eq.s32.totalorder %v2101_v50, 2  ;;  %v644_v33 = vmul.f32 %v2124_v4, %v2124_v4  ;;  %v2131_v26 = vand.u32 3, %v660_v36  ;;  %v776_v27 = vsel %vm774_vm5, %v775_v53, %v2113_v55 }
 0x120   : > { %v495_v5 = vadd.f32 1.0, %v494_v12  ;;  %v502_v6 = vadd.f32 1.0, %v501_v46  ;;  %v777_v63 = vclz %v776_v27  ;;  %v894_v56 = vadd.s32 %v892_v2, %v890_v7 }
 0x121   : > { %vm993_vm8 = vcmask 785408   ;;  %v645_v47 = vmul.f32 -0.001358992, %v644_v33  ;;  %v652_v57 = vmul.f32 -0.00019511016, %v644_v33  ;;  %v765_v22 = vadd.s32 %v2043_v23, %v2039_v42 }
 0x122   : > { %v503_v59 = vmul.f32 %v502_v6, %v2078_v15  ;;  %v512_v30 = vxor.u32 2147483648, %v495_v5  ;;  %v1251_v28 = vadd.s32 4294967294, %v777_v63  ;;  %v884_v38 = vshrl.u32 %v2093_v32, 16 }
 0x123   : > { %v1055_v51 = vmul.f32 %v1044_v58, %v1572_v11  ;;  %v646_v10 = vadd.f32 0.041655596, %v645_v47  ;;  %v653_v44 = vadd.f32 0.008332121, %v652_v57  ;;  %v900_v54 = vshrl.u32 %v2067_v39, 16 }
 0x124   : > { %v509_v29 = vxor.u32 2147483648, %v503_v59  ;;  %vm1252_vm12 = vcmp.lt.s32.totalorder %v1251_v28, 0  ;;  %v895_v31 = vadd.s32 %v894_v56, %v884_v38  ;;  %v899_v13 = vand.u32 65535, %v2067_v39 }
 0x125   : > { %v513_v42 = vsel %vm511_vm3, %v512_v30, %v503_v59  ;;  %v647_v23 = vmul.f32 %v646_v10, %v644_v33  ;;  %v654_v15 = vmul.f32 %v653_v44, %v644_v33  ;;  %v780_v43 = vsel %vm1252_vm12, 0, %v1251_v28 }
 0x126   : > { %v510_v32 = vsel %vm508_vm10, %v495_v5, %v509_v29  ;;  %v781_v18 = vsub.s32 32, %v780_v43  ;;  %v782_v11 = vshll.u32 %v2113_v55, %v780_v43  ;;  %v785_v60 = vsub.s32 4294967266, %v780_v43 }
 0x127   : > { %v514_v17 = vsel %vm507_vm1, %v510_v32, %v513_v42  ;;  %v648_v3 = vadd.f32 -0.4999988, %v647_v23  ;;  %v655_v21 = vadd.f32 -0.16666654, %v654_v15  ;;  %v902_v39 = vmul.u32 %v900_v54, %v2006_v8 }
 0x128   : > { %v515_v48 = vsel %vm504_vm4, nan, %v514_v17  ;;  %v783_v20 = vshrl.u32 %v765_v22, %v781_v18  ;;  %v786_v62 = vadd.s32 127, %v785_v60  ;;  %v903_v34 = vmul.u32 %v899_v13, %v2027_v41 }
 0x129   : > { %1256 = vmatmul.msk.f32.vlgmr.msra.gmra.mxu3 %vm993_vm8, %v515_v48  ;;  %v649_v61 = vmul.f32 %v648_v3, %v644_v33  ;;  %v656_v36 = vmul.f32 %v655_v21, %v644_v33  ;;  %vm662_vm2 = vcmp.lt.s32.totalorder %v2131_v26, 2  ;;  %v886_v50 = vshrl.u32 %v2099_v45, 16 }
 0x12a   : > { %v905_v55 = vshll.u32 %v902_v39, 16  ;;  %vm659_vm9 = vweird.f32 %v1599_v24  ;;  %v1074_v35 = vmul.f32 %v1063_v1, %v1055_v51  ;;  %v784_v25 = vor.u32 %v783_v20, %v782_v11 }
 0x12b   : > { %v787_v7 = vshll.u32 %v786_v62, 23  ;;  %v1059_v16 = vlaneseq  ;;  %v650_v58 = vadd.f32 1.0, %v649_v61  ;;  %v657_v37 = vadd.f32 1.0, %v656_v36 }
 0x12c   : > { %v896_v53 = vadd.s32 %v895_v31, %v886_v50  ;;  %v901_v12 = vmul.u32 %v899_v13, %v2006_v8  ;;  %v904_v33 = vmul.u32 %v900_v54, %v2027_v41  ;;  %v907_v27 = vshll.u32 %v903_v34, 16 }
 0x12d   : > { %v788_v46 = vor.u32 4788187, %v787_v7  ;;  %v2157_v2 = vand.u32 127, %v1059_v16  ;;  %v658_v45 = vmul.f32 %v657_v37, %v2124_v4  ;;  %v667_v5 = vxor.u32 2147483648, %v650_v58  ;;  %v1046_v7 = vpop.permute.xlu1 %1045 }
 0x12e   : > { %vm909_vm11 = vc.u32 %v901_v12, %v905_v55  ;;  %v911_v6 = vadd.s32 %v905_v55, %v901_v12  ;;  %v791_v56 = vcvt.s32.f32 %v784_v25  ;;  %vm663_vm13 = vcmp.eq.s32.totalorder %v2131_v26, 0 }
 0x12f   : > { %v789_v63 = vand.u32 2147483647, %v788_v46  ;;  %vm1061_vm7 = vcmp.ge.s32.totalorder %v2157_v2, 8  ;;  %v910_v47 = vsel %vm909_vm11, 1, %v2279_v49  ;;  %v664_v8 = vxor.u32 2147483648, %v658_v45 }
 0x130   : > { %v1078_v57 = vsel %vm1061_vm7, %v1074_v35, %v1055_v51  ;;  %v912_v22 = vadd.s32 %v910_v47, %v904_v33  ;;  %vm666_vm14 = vcmp.eq.s32.totalorder %v2131_v26, 2  ;;  %vm913_vm15 = vc.u32 %v911_v6, %v907_v27 }
 0x131   : > { %v792_v41 = vmul.f32 %v791_v56, %v789_v63  ;;  %1260 = vmatmul.msk.f32.vlgmr.msrb.gmra.mxu0 %vm253_vm0, %v1078_v57  ;;  %v915_v4 = vadd.s32 %v911_v6, %v907_v27  ;;  %v665_v59 = vsel %vm663_vm13, %v650_v58, %v664_v8  ;;  %v668_v30 = vsel %vm666_vm14, %v667_v5, %v658_v45  ;;  %v1048_v63 = vpop.permute.xlu2 %1047 }
 0x132   : > { %v906_v28 = vshrl.u32 %v902_v39, 16  ;;  %v914_v38 = vsel %vm913_vm15, 1, %v2279_v49  ;;  %v669_v10 = vsel %vm662_vm2, %v665_v59, %v668_v30  ;;  %vm673_vm6 = vcmp.lt.s32.totalorder %v1630_v52, 0 }
 0x133   : > { %v793_v44 = vxor.u32 2147483648, %v792_v41  ;;  %v916_v54 = vadd.s32 %v914_v38, %v912_v22  ;;  %v2171_v29 = vadd.s32 %v915_v4, %v896_v53  ;;  %v670_v51 = vsel %vm659_vm9, nan, %v669_v10 }
 0x134   : > { %vm921_vm10 = vc.u32 %v896_v53, %v915_v4  ;;  %1257 = vmatmul.msk.f32.gmra.mxu3 %vm993_vm8, %v670_v51  ;;  %v2287_v31 = vand.u32 2147483647, %v1630_v52  ;;  %v908_v26 = vshrl.u32 %v903_v34, 16  ;;  %v795_v23 = vsub.s32 4, %v2104_v0 }
 0x135   : > { %v794_v49 = vsel %vm673_vm6, %v793_v44, %v792_v41  ;;  %v917_v42 = vadd.s32 %v916_v54, %v906_v28  ;;  %v919_v17 = vmul.u32 %v1977_v40, %v2059_v9  ;;  %vm814_vm2 = vweird.f32 %v1630_v52  ;;  %v1065_v8 = vpop.permute.xlu1 %1064 }
 0x136   : > { %vm2179_vm5 = vcmp.le.f32.partialorder %v2287_v31, 0.7853982  ;;  %v796_v60 = vsel %vm673_vm6, %v795_v23, %v2104_v0  ;;  %v1056_v57 = vmul.f32 %v1046_v7, %v1583_v14  ;;  %v1057_v31 = vmul.f32 %v1048_v63, %v1592_v19 }
 0x137   : > { %v797_v15 = vsel %vm2179_vm5, %v1630_v52, %v794_v49  ;;  %v918_v43 = vadd.s32 %v917_v42, %v908_v26  ;;  %v798_v48 = vsel %vm2179_vm5, 0, %v796_v60  ;;  %v1050_v42 = vpop.permute.xlu0 %1049 }
 0x138   : > { %v799_v24 = vmul.f32 %v797_v15, %v797_v15  ;;  %v815_v50 = vadd.s32 3, %v798_v48  ;;  %v1075_v59 = vmul.f32 %v1065_v8, %v1056_v57 }
 0x139   : > { %v922_v11 = vadd.s32 1, %v918_v43  ;;  %v1067_v54 = vpop.permute.xlu2 %1066 }
 0x13a   : > { %v800_v32 = vmul.f32 -0.001358992, %v799_v24  ;;  %v807_v18 = vmul.f32 -0.00019511016, %v799_v24  ;;  %v816_v16 = vand.u32 3, %v815_v50  ;;  %v1079_v44 = vsel %vm1061_vm7, %v1075_v59, %v1056_v57 }
 0x13b   : > { %v923_v1 = vsel %vm921_vm10, %v922_v11, %v918_v43  ;;  %1261 = vmatmul.msk.f32.gmra.mxu0 %vm253_vm0, %v1079_v44  ;;  %v1076_v49 = vmul.f32 %v1067_v54, %v1057_v31 }
 0x13c   : > { %v801_v3 = vadd.f32 0.041655596, %v800_v32  ;;  %v808_v21 = vadd.f32 0.008332121, %v807_v18  ;;  %v924_v39 = vadd.s32 %v923_v1, %v919_v17  ;;  %vm818_vm4 = vcmp.eq.s32.totalorder %v816_v16, 0 }
 0x13d   : > { %vm821_vm3 = vcmp.eq.s32.totalorder %v816_v16, 2  ;;  %vm817_vm12 = vcmp.lt.s32.totalorder %v816_v16, 2  ;;  %v1080_v32 = vsel %vm1061_vm7, %v1076_v49, %v1057_v31  ;;  %v1069_v60 = vpop.permute.xlu1 %1068 }
 0x13e   : > { %v802_v20 = vmul.f32 %v801_v3, %v799_v24  ;;  %v809_v62 = vmul.f32 %v808_v21, %v799_v24  ;;  %v925_v34 = vadd.s32 536870912, %v924_v39 }
 0x140   : > { %v803_v61 = vadd.f32 -0.4999988, %v802_v20  ;;  %v810_v36 = vadd.f32 -0.16666654, %v809_v62  ;;  %v926_v55 = vshrl.u32 %v925_v34, 30 }
 0x142   : > { %v804_v35 = vmul.f32 %v803_v61, %v799_v24  ;;  %v811_v0 = vmul.f32 %v810_v36, %v799_v24  ;;  %v927_v25 = vshll.u32 %v926_v55, 30  ;;  %v2291_v24 = vld [vmem:[#allocation10_spill] sm:$0xff] }
 0x143   : > { %v1058_v43 = vmul.f32 %v1050_v42, %v2291_v24  ;;  %1262 = vmatmul.msk.f32.gmra.mxu0 %vm253_vm0, %v1080_v32 }
 0x144   : > { %v805_v40 = vadd.f32 1.0, %v804_v35  ;;  %v812_v9 = vadd.f32 1.0, %v811_v0  ;;  %v928_v58 = vsub.s32 %v924_v39, %v927_v25 }
 0x145   : > { %v1077_v1 = vmul.f32 %v1069_v60, %v1058_v43 }
 0x146   : > { %v813_v37 = vmul.f32 %v812_v9, %v797_v15  ;;  %v822_v53 = vxor.u32 2147483648, %v805_v40  ;;  %vm929_vm1 = vcmp.lt.s32.totalorder %v928_v58, 0  ;;  %v930_v12 = vsub.s32 0, %v928_v58  ;;  %v2290_v15 = vld [vmem:[#allocation11_spill] sm:$0xff] }
 0x147   : > { %vm828_vm11 = vcmp.lt.s32.totalorder %v2290_v15, 0  ;;  %v2292_v18 = vand.u32 2147483647, %v2290_v15  ;;  %v1081_v61 = vsel %vm1061_vm7, %v1077_v1, %v1058_v43  ;;  %vm969_vm6 = vweird.f32 %v2290_v15 }
 0x148   : > { %v819_v46 = vxor.u32 2147483648, %v813_v37  ;;  %v931_v33 = vsel %vm929_vm1, %v930_v12, %v928_v58  ;;  %v823_v45 = vsel %vm821_vm3, %v822_v53, %v813_v37 }
 0x149   : > { %v932_v5 = vclz %v931_v33  ;;  %vm2207_vm13 = vcmp.le.f32.partialorder %v2292_v18, 0.7853982 }
 0x14a   : > { %v820_v27 = vsel %vm818_vm4, %v805_v40, %v819_v46 }
 0x14b   : > { %v824_v6 = vsel %vm817_vm12, %v820_v27, %v823_v45  ;;  %v1254_v47 = vadd.s32 4294967294, %v932_v5  ;;  %1263 = vmatmul.msk.f32.gmra.mxu0 %vm253_vm0, %v1081_v61  ;;  %v283_v27 = vpop.f32.mrf.mxu0 }
 0x14c   : > { %v825_v56 = vsel %vm814_vm2, nan, %v824_v6 }
 0x14d   : > { %1258 = vmatmul.msk.f32.gmra.mxu3 %vm993_vm8, %v825_v56  ;;  %vm1255_vm9 = vcmp.lt.s32.totalorder %v1254_v47, 0 }
 0x14e   : > { %v935_v22 = vsel %vm1255_vm9, 0, %v1254_v47 }
 0x14f   : > { %v936_v41 = vsub.s32 32, %v935_v22  ;;  %v940_v4 = vsub.s32 4294967266, %v935_v22  ;;  %v937_v30 = vshll.u32 %v928_v58, %v935_v22 }
 0x151   : > { %v938_v28 = vshrl.u32 %v2171_v29, %v936_v41  ;;  %v941_v38 = vadd.s32 127, %v940_v4  ;;  %v950_v29 = vsub.s32 4, %v926_v55  ;;  %v2295_v4 = vld [vmem:[#allocation8_spill] sm:$0xff] }
 0x153   : > { %v939_v10 = vor.u32 %v938_v28, %v937_v30  ;;  %v942_v52 = vshll.u32 %v941_v38, 23  ;;  %v951_v21 = vsel %vm828_vm11, %v950_v29, %v926_v55  ;;  %v286_v45 = vpop.f32.mrf.mxu0 }
 0x154   : > { %v953_v20 = vsel %vm2207_vm13, 0, %v951_v21 }
 0x155   : > { %v943_v51 = vor.u32 4788187, %v942_v52  ;;  %v946_v13 = vcvt.s32.f32 %v939_v10  ;;  %v970_v35 = vadd.s32 3, %v953_v20  ;;  %v2296_v52 = vld [vmem:[#allocation9_spill] sm:$0xff] }
 0x157   : > { %v944_v14 = vand.u32 2147483647, %v943_v51  ;;  %v971_v40 = vand.u32 3, %v970_v35 }
 0x159   : > { %v947_v26 = vmul.f32 %v946_v13, %v944_v14  ;;  %vm976_vm14 = vcmp.eq.s32.totalorder %v971_v40, 2  ;;  %vm973_vm15 = vcmp.eq.s32.totalorder %v971_v40, 0  ;;  %vm972_vm7 = vcmp.lt.s32.totalorder %v971_v40, 2 }
 0x15b   : > { %v948_v23 = vxor.u32 2147483648, %v947_v26 }
 0x15d   : > { %v949_v19 = vsel %vm828_vm11, %v948_v23, %v947_v26 }
 0x15e   : > { %v952_v17 = vsel %vm2207_vm13, %v2290_v15, %v949_v19 }
 0x15f   : > { %v954_v3 = vmul.f32 %v952_v17, %v952_v17 }
 0x161   : > { %v955_v39 = vmul.f32 -0.001358992, %v954_v3  ;;  %v962_v48 = vmul.f32 -0.00019511016, %v954_v3 }
 0x163   : > { %v956_v62 = vadd.f32 0.041655596, %v955_v39  ;;  %v963_v34 = vadd.f32 0.008332121, %v962_v48 }
 0x165   : > { %v957_v36 = vmul.f32 %v956_v62, %v954_v3  ;;  %v964_v50 = vmul.f32 %v963_v34, %v954_v3 }
 0x167   : > { %v958_v0 = vadd.f32 -0.4999988, %v957_v36  ;;  %v965_v25 = vadd.f32 -0.16666654, %v964_v50 }
 0x169   : > { %v959_v7 = vmul.f32 %v958_v0, %v954_v3  ;;  %v966_v55 = vmul.f32 %v965_v25, %v954_v3 }
 0x16b   : > { %v960_v9 = vadd.f32 1.0, %v959_v7  ;;  %v967_v16 = vadd.f32 1.0, %v966_v55 }
 0x16d   : > { %v968_v58 = vmul.f32 %v967_v16, %v952_v17  ;;  %v977_v37 = vxor.u32 2147483648, %v960_v9 }
 0x16f   : > { %v974_v53 = vxor.u32 2147483648, %v968_v58  ;;  %v978_v12 = vsel %vm976_vm14, %v977_v37, %v968_v58 }
 0x171   : > { %v975_v2 = vsel %vm973_vm15, %v960_v9, %v974_v53 }
 0x172   : > { %v979_v46 = vsel %vm972_vm7, %v975_v2, %v978_v12 }
 0x173   : > { %v980_v33 = vsel %vm969_vm6, nan, %v979_v46 }
 0x174   : > { %1259 = vmatmul.msk.f32.gmra.mxu3 %vm993_vm8, %v980_v33 }
 0x1ac   : > { %v1023_v5 = vpop.f32.mrf.mxu3 }
 0x1ad   : > { %v1035_v6 = vadd.f32 %v1023_v5, %v283_v27 }
 0x1ae   : > { %v1113_v63 = vpop.f32.mrf.mxu0 }
 0x1af   : > { %v1125_v56 = vadd.f32 %v1113_v63, %v1035_v6 }
 0x1b1   : > { %1129 = vst [vmem:[%s235_s7] sm:$0xff] %v1125_v56 }
 0x1b7   : > { %v1026_v47 = vpop.f32.mrf.mxu3 }
 0x1b8   : > { %v1036_v8 = vadd.f32 %v1026_v47, %v286_v45  ;;  %v1116_v57 = vpop.f32.mrf.mxu0 }
 0x1ba   : > { %v1126_v22 = vadd.f32 %v1116_v57, %v1036_v8 }
 0x1bc   : > { %1130 = vst [vmem:[%s235_s7 + $0x8] sm:$0xff] %v1126_v22 }
 0x1c0   : > { %v1119_v30 = vpop.f32.mrf.mxu0 }
 0x1c8   : > { %v1122_v10 = vpop.f32.mrf.mxu0 }
 0x1d0   : > { %v1029_v41 = vpop.f32.mrf.mxu3 }
 0x1d1   : > { %v1037_v59 = vadd.f32 %v1029_v41, %v2295_v4 }
 0x1d3   : > { %v1127_v28 = vadd.f32 %v1119_v30, %v1037_v59 }
 0x1d5   : > { %1131 = vst [vmem:[%s235_s7 + $0x10] sm:$0xff] %v1127_v28 }
 0x1f7   : > { %v1032_v38 = vpop.f32.mrf.mxu3 }
 0x1f8   : > { %v1038_v44 = vadd.f32 %v1032_v38, %v2296_v52 }
 0x1fa   : > { %v1128_v54 = vadd.f32 %v1122_v10, %v1038_v44 }
 0x1fc   : > { %1132 = vst [vmem:[%s235_s7 + $0x18] sm:$0xff] %v1128_v54 }
 0x1fd   : > { %1393 = shalt.err (!%p1390_p8)
}
 0x1fe   : > { %s1446_s30 = smov 128   ;;  %s1447_s6 = smov 8  }
 0x1ff   : > { %1276 = dma.vmem_to_hbm [thread:$0]  (%p1516_p5), %s1147_s12, 512, %s1149_s13, %s1134_s14, %s1446_s30, %s1446_s30, %s1447_s6  }
 0x200 PF: > { %p1288_p9 = scmp.ge.s32.totalorder %s1432_s21, 2  ;;  %s1163_s7 = sand.u32 1, %s1420_s18  }
 0x201   : > { %s1164_s8 = scalar_lea.sflag [#allocation4], %s1163_s7 }
 0x202   : > { %p1283_p10 = pnand %p1288_p9, %p1520_p6 }
 0x204   : > { %p1284_p11 = pneg %p1283_p10 }
 0x206   : > { %1415 = dma.done.wait (%p1284_p11), %s1164_s8, 512  }
 0x207   : > { %1417 = vsyncadd (%p1284_p11), %s1164_s8, 4294966784  ;;  %p16_p12 = scmp.ge.s32.totalorder %s1503_s24, 4   ;;  %s2297_s18 = smov %s1424_s19 }
 0x208   : > { %s2298_s19 = smov %s1428_s20  ;;  %s2299_s20 = smov %s1514_s27 }
 0x209   : > { %s2300_s21 = smov %s1503_s24  ;;  %18 = sbr.rel (!%p16_p12) target bundleno = 4 (0x4), region = 80 }
 0x20e   :  { %1170 = vsyncpa [#allocation3], 1 }
 0x20f   :  { %1172 = vsyncpa [#allocation3 + $0x1], 1 }
 0x210   :  { %1173 = vsyncpa [#allocation4], 1 }
 0x211   :  { %1175 = vsyncpa [#allocation4 + $0x1], 1 }

</bundles_post_ra>
